<compile_context>
chip_gen: v7x
topology: tpu7x:2x2x1
jax: 0.10.0
libtpu: 0.0.40
codegen_flags: <defaults>
</compile_context>

<pallas_src>
import jax
import jax.numpy as jnp
from jax.experimental import pallas as pl
from jax.experimental.pallas import tpu as pltpu


def _round_up(x, m):
    return (x + m - 1) // m * m


def _cdiv(a, b):
    return -(-a // b)


# ----------------------------------------------------------------------------
# Kernel body
# ----------------------------------------------------------------------------
def decoder_kernel(x_ref, w1_ref, b1_ref, w2_ref, b2_ref, o_ref):
    # hidden = relu(x @ W1 + b1)
    #   x is cast to bf16 in-register (compute-format only; HBM stream stays
    #   native dtype), MXU accumulates in f32, bias/ReLU in f32 on the VPU.
    x = x_ref[...].astype(jnp.bfloat16)
    h = jnp.dot(x, w1_ref[...], preferred_element_type=jnp.float32)
    h = jnp.maximum(h + b1_ref[...], 0.0)                    # [tb, H] + [1, H]

    # out = sigmoid(h @ W2 + b2)
    y = jnp.dot(h.astype(jnp.bfloat16), w2_ref[...],
                preferred_element_type=jnp.float32)
    y = y + b2_ref[...]                                      # [tb, D] + [1, D]

    # EUP-shaped sigmoid: exp on the EUP, approx reciprocal (vrcp) instead of
    # a VALU divide.  Kept in f32 so it is safe on v5e as well.
    o_ref[...] = pl.reciprocal(1.0 + jnp.exp(-y), approx=True).astype(o_ref.dtype)


# ----------------------------------------------------------------------------
# Tile-size / VMEM heuristics
# ----------------------------------------------------------------------------
def _vmem_budget_bytes():
    """Request half of physical per-TensorCore VMEM (queried when possible)."""
    try:
        cap = int(pltpu.get_tpu_info().vmem_capacity_bytes)
    except Exception:
        cap = 64 << 20          # conservative fallback (v7x-sized physical)
    return min(cap // 2, 64 << 20)


def _choose_tile_b(B, hbm_row_bytes, target_rows, vmem_cap_rows,
                   min_steps=8, min_step_bytes=2 << 20):
    """Pick the batch tile: large per-step payload, >= min_steps grid steps on
    big batches (v7x megacore + pipeline), never inflating work on small B,
    always a multiple of 8 sublanes, rebalanced so the last block is ~full."""
    B8 = _round_up(max(B, 1), 8)
    tile = max(8, min(target_rows, vmem_cap_rows, B8))
    tile = _round_up(tile, 8)
    steps = _cdiv(B8, tile)
    # Only force extra steps when every step still moves >= min_step_bytes.
    total_bytes = B8 * hbm_row_bytes
    steps_floor = max(1, min(min_steps, total_bytes // min_step_bytes))
    steps = max(steps, steps_floor)
    tile = max(8, _round_up(_cdiv(B8, steps), 8))
    return min(tile, B8)


# ----------------------------------------------------------------------------
# Wrapper
# ----------------------------------------------------------------------------
def decoder_forward(x, w1, b1, w2, b2, *, out_dtype=None,
                    target_step_bytes=4 << 20):
    """x: [B, Z]; w1: [Z, H]; b1: [H] or [1, H]; w2: [H, D]; b2: [D] or [1, D]."""
    B, Z = x.shape
    Zw, H = w1.shape
    Hw, D = w2.shape
    assert Z == Zw and H == Hw
    if out_dtype is None:
        out_dtype = x.dtype

    x_bytes = jnp.dtype(x.dtype).itemsize
    o_bytes = jnp.dtype(out_dtype).itemsize

    # (a) DMA-payload target: ~target_step_bytes of x+out HBM traffic per grid
    #     step, amortizing the ~0.35 us per-step overhead.
    hbm_row_bytes = Z * x_bytes + D * o_bytes
    target_rows = max(512, target_step_bytes // hbm_row_bytes)

    # (b) VMEM ceiling with correct lane rounding: every VMEM buffer's last
    #     dim occupies a multiple of 128 lanes (the (tile_b, 8) x tile really
    #     holds tile_b x 128 lanes).
    Zl, Hl, Dl = (_round_up(d, 128) for d in (Z, H, D))
    per_row_vmem = (2 * Zl * x_bytes        # x tile, double-buffered
                    + 2 * Dl * o_bytes      # out tile, double-buffered
                    + Zl * 2                # bf16 copy of x
                    + Hl * (4 + 2)          # f32 hidden + bf16 copy
                    + Dl * 4)               # f32 logits
    weights_vmem = 2 * 2 * (Zl * Hl + Hl * Dl) + 8 * (Hl + Dl) * 4
    vmem_budget = _vmem_budget_bytes()
    vmem_cap_rows = max(8, (int(vmem_budget * 0.75) - weights_vmem) // per_row_vmem)

    tile_b = _choose_tile_b(B, hbm_row_bytes, target_rows, vmem_cap_rows)
    grid = (_cdiv(B, tile_b),)          # ragged last block handled by Pallas

    # Tiny weight/bias casts stay in the wrapper; x and the output are never
    # touched outside the kernel (no extra HBM passes, no pad/slice).
    w1p = w1.astype(jnp.bfloat16)
    w2p = w2.astype(jnp.bfloat16)
    b1p = jnp.reshape(b1, (1, H)).astype(jnp.float32)
    b2p = jnp.reshape(b2, (1, D)).astype(jnp.float32)

    cost = pl.CostEstimate(
        flops=2 * B * (Z * H + H * D),
        transcendentals=B * D,
        bytes_accessed=B * Z * x_bytes + B * D * o_bytes
                       + 2 * (Z * H + H * D) + 4 * (H + D),
    )

    return pl.pallas_call(
        decoder_kernel,
        out_shape=jax.ShapeDtypeStruct((B, D), out_dtype),
        grid_spec=pltpu.PrefetchScalarGridSpec(
            num_scalar_prefetch=0,
            grid=grid,
            in_specs=[
                pl.BlockSpec((tile_b, Z), lambda i: (i, 0)),   # x tile over batch
                pl.BlockSpec((Z, H), lambda i: (0, 0)),        # W1 (VMEM-resident)
                pl.BlockSpec((1, H), lambda i: (0, 0)),        # b1 (resident)
                pl.BlockSpec((H, D), lambda i: (0, 0)),        # W2 (resident)
                pl.BlockSpec((1, D), lambda i: (0, 0)),        # b2 (resident)
            ],
            out_specs=pl.BlockSpec((tile_b, D), lambda i: (i, 0)),
        ),
        compiler_params=pltpu.CompilerParams(
            dimension_semantics=("parallel",),   # batch axis -> megacore on v7x
            vmem_limit_bytes=int(vmem_budget),
        ),
        cost_estimate=cost,
    )(x, w1p, b1p, w2p, b2p)


# ----------------------------------------------------------------------------
# Params / reference / test
# ----------------------------------------------------------------------------
def init_decoder_params(key, z_dim, hidden_dim, input_dim, dtype=jnp.float32):
    """Deterministic synthetic init (PyTorch nn.Linear-style uniform bounds)."""
    k1, k2, k3, k4 = jax.random.split(key, 4)
    bound1 = 1.0 / jnp.sqrt(z_dim)
    bound2 = 1.0 / jnp.sqrt(hidden_dim)
    w1 = jax.random.uniform(k1, (z_dim, hidden_dim), dtype, -bound1, bound1)
    b1 = jax.random.uniform(k2, (1, hidden_dim), dtype, -bound1, bound1)
    w2 = jax.random.uniform(k3, (hidden_dim, input_dim), dtype, -bound2, bound2)
    b2 = jax.random.uniform(k4, (1, input_dim), dtype, -bound2, bound2)
    return w1, b1, w2, b2


def decoder_reference(x, w1, b1, w2, b2):
    h = jnp.maximum(x @ w1 + b1, 0.0)
    return jax.nn.sigmoid(h @ w2 + b2)


if __name__ == "__main__":
    # Small shapes consistent with the module: z_dim=8, hidden_dim=32, input_dim=64
    batch, z_dim, hidden_dim, input_dim = 8, 8, 32, 64

    key = jax.random.PRNGKey(0)
    kx, kp = jax.random.split(key)
    x = jax.random.normal(kx, (batch, z_dim), jnp.float32)
    w1, b1, w2, b2 = init_decoder_params(kp, z_dim, hidden_dim, input_dim)

    out = decoder_forward(x, w1, b1, w2, b2)
    out = jax.block_until_ready(out)

    ref = decoder_reference(x, w1, b1, w2, b2)
    assert out.shape == (batch, input_dim)
    assert out.dtype == x.dtype
    # bf16 MXU inputs + approx reciprocal -> small deviation vs pure-f32 ref.
    assert jnp.allclose(out, ref, atol=2e-2, rtol=2e-2)

    print("KERNEL_OK")
</pallas_src>

<mosaic_0001>
module attributes {stable_mosaic.version = 11 : i64} {
  func.func @decoder_kernel(%arg0: i32, %arg1: memref<8x8xf32, #tpu.memory_space<vmem>>, %arg2: memref<8x32xbf16, #tpu.memory_space<vmem>>, %arg3: memref<1x32xf32, #tpu.memory_space<vmem>>, %arg4: memref<32x64xbf16, #tpu.memory_space<vmem>>, %arg5: memref<1x64xf32, #tpu.memory_space<vmem>>, %arg6: memref<8x64xf32, #tpu.memory_space<vmem>>) attributes {dimension_semantics = [#tpu.dimension_semantics<parallel>], iteration_bounds = array<i64: 1>, scalar_prefetch = 0 : i64, scratch_operands = 0 : i64, tpu.core_type = #tpu.core_type<tc>, window_params = [{transform_indices = @transform_0, window_bounds = array<i64: 8, 8>}, {pipeline_mode = #tpu.pipeline_mode<synchronous>, transform_indices = @transform_1, window_bounds = array<i64: 8, 32>}, {pipeline_mode = #tpu.pipeline_mode<synchronous>, transform_indices = @transform_2, window_bounds = array<i64: 1, 32>}, {pipeline_mode = #tpu.pipeline_mode<synchronous>, transform_indices = @transform_3, window_bounds = array<i64: 32, 64>}, {pipeline_mode = #tpu.pipeline_mode<synchronous>, transform_indices = @transform_4, window_bounds = array<i64: 1, 64>}, {transform_indices = @transform_5, window_bounds = array<i64: 8, 64>}]} {
    %c0 = arith.constant 0 : index
    %c0_0 = arith.constant 0 : index
    %0 = vector.load %arg1[%c0, %c0_0] : memref<8x8xf32, #tpu.memory_space<vmem>>, vector<8x8xf32>
    %1 = arith.truncf %0 : vector<8x8xf32> to vector<8x8xbf16>
    %c0_1 = arith.constant 0 : index
    %c0_2 = arith.constant 0 : index
    %2 = vector.load %arg2[%c0_1, %c0_2] : memref<8x32xbf16, #tpu.memory_space<vmem>>, vector<8x32xbf16>
    %cst = arith.constant dense<0.000000e+00> : vector<8x32xf32>
    %3 = tpu.matmul %1, %2, %cst {dimension_numbers = #tpu.dot_dimension_numbers<[1], [0], [0], [1], [0, 0, 1, 1], [], []>} : vector<8x8xbf16>, vector<8x32xbf16>, vector<8x32xf32> -> vector<8x32xf32>
    %c0_3 = arith.constant 0 : index
    %c0_4 = arith.constant 0 : index
    %4 = vector.load %arg3[%c0_3, %c0_4] : memref<1x32xf32, #tpu.memory_space<vmem>>, vector<1x32xf32>
    %5 = vector.broadcast %4 : vector<1x32xf32> to vector<8x32xf32>
    %6 = arith.addf %3, %5 : vector<8x32xf32>
    %cst_5 = arith.constant 0.000000e+00 : f32
    %7 = vector.broadcast %cst_5 : f32 to vector<8x32xf32>
    %8 = arith.maximumf %6, %7 : vector<8x32xf32>
    %9 = arith.truncf %8 : vector<8x32xf32> to vector<8x32xbf16>
    %c0_6 = arith.constant 0 : index
    %c0_7 = arith.constant 0 : index
    %10 = vector.load %arg4[%c0_6, %c0_7] : memref<32x64xbf16, #tpu.memory_space<vmem>>, vector<32x64xbf16>
    %cst_8 = arith.constant dense<0.000000e+00> : vector<8x64xf32>
    %11 = tpu.matmul %9, %10, %cst_8 {dimension_numbers = #tpu.dot_dimension_numbers<[1], [0], [0], [1], [0, 0, 1, 1], [], []>} : vector<8x32xbf16>, vector<32x64xbf16>, vector<8x64xf32> -> vector<8x64xf32>
    %c0_9 = arith.constant 0 : index
    %c0_10 = arith.constant 0 : index
    %12 = vector.load %arg5[%c0_9, %c0_10] : memref<1x64xf32, #tpu.memory_space<vmem>>, vector<1x64xf32>
    %13 = vector.broadcast %12 : vector<1x64xf32> to vector<8x64xf32>
    %14 = arith.addf %11, %13 : vector<8x64xf32>
    %cst_11 = arith.constant 0.000000e+00 : f32
    %15 = vector.broadcast %cst_11 : f32 to vector<8x64xf32>
    %16 = arith.subf %15, %14 : vector<8x64xf32>
    %17 = math.exp %16 : vector<8x64xf32>
    %cst_12 = arith.constant 1.000000e+00 : f32
    %18 = vector.broadcast %cst_12 : f32 to vector<8x64xf32>
    %19 = arith.addf %18, %17 : vector<8x64xf32>
    %20 = tpu.reciprocal %19 {approx = true} : vector<8x64xf32> -> vector<8x64xf32>
    %c0_13 = arith.constant 0 : index
    %c0_14 = arith.constant 0 : index
    %21 = vector.load %arg6[%c0_13, %c0_14] : memref<8x64xf32, #tpu.memory_space<vmem>>, vector<8x64xf32>
    tpu.vector_store %arg6[%c0_13, %c0_14], %20 {strides = array<i32>} : memref<8x64xf32, #tpu.memory_space<vmem>>, vector<8x64xf32>,
    return
  }
  func.func @transform_0(%arg0: i32) -> (i32, i32) {
    %c0_i32 = arith.constant 0 : i32
    %c0_i32_0 = arith.constant 0 : i32
    return %arg0, %c0_i32 : i32, i32
  }
  func.func @transform_1(%arg0: i32) -> (i32, i32) {
    %c0_i32 = arith.constant 0 : i32
    %c0_i32_0 = arith.constant 0 : i32
    %c0_i32_1 = arith.constant 0 : i32
    return %c0_i32, %c0_i32_0 : i32, i32
  }
  func.func @transform_2(%arg0: i32) -> (i32, i32) {
    %c0_i32 = arith.constant 0 : i32
    %c0_i32_0 = arith.constant 0 : i32
    %c0_i32_1 = arith.constant 0 : i32
    return %c0_i32, %c0_i32_0 : i32, i32
  }
  func.func @transform_3(%arg0: i32) -> (i32, i32) {
    %c0_i32 = arith.constant 0 : i32
    %c0_i32_0 = arith.constant 0 : i32
    %c0_i32_1 = arith.constant 0 : i32
    return %c0_i32, %c0_i32_0 : i32, i32
  }
  func.func @transform_4(%arg0: i32) -> (i32, i32) {
    %c0_i32 = arith.constant 0 : i32
    %c0_i32_0 = arith.constant 0 : i32
    %c0_i32_1 = arith.constant 0 : i32
    return %c0_i32, %c0_i32_0 : i32, i32
  }
  func.func @transform_5(%arg0: i32) -> (i32, i32) {
    %c0_i32 = arith.constant 0 : i32
    %c0_i32_0 = arith.constant 0 : i32
    return %arg0, %c0_i32 : i32, i32
  }
}

</mosaic_0001>

<bundles_post_ra>
// kernel: tpu_custom_call.1
= control target key start
LH: loop header
LB: loop body
LE: loop exit
PB: predicated region body
PF: predicated region fallthrough
CT: control target
= control target key end

     0   :  { %10 = vsyncpa [#allocation3], 0  ;;  %s434_s0 = inlined_call_operand.hbm [shape: f32[8,8], index: 0, kind: input, shape index: {}]   ;;  %s435_s1 = inlined_call_operand.hbm [shape: bf16[8,32], index: 1, kind: input, shape index: {}]   ;;  %s436_s2 = inlined_call_operand.vmem [shape: f32[1,32], index: 2, kind: input, shape index: {}]   ;;  %s437_s3 = inlined_call_operand.hbm [shape: bf16[32,64], index: 3, kind: input, shape index: {}]   ;;  %s438_s4 = inlined_call_operand.vmem [shape: f32[1,64], index: 4, kind: input, shape index: {}]   ;;  %s439_s5 = inlined_call_operand.hbm [shape: f32[8,64], index: 5, kind: output, shape index: {}]  }
   0x1   :  { %11 = vsyncpa [#allocation6], 0 }
   0x2   :  { %12 = vsyncpa [#allocation4], 0  ;;  %s342_s18 = smov [#allocation5]   ;;  %s343_s20 = smov [#allocation2]  }
   0x3   :  { %s29_s19 = sshll.u32 %s342_s18, 4  ;;  %s19_s21 = sshll.u32 %s343_s20, 4  ;;  %s30_s19 = int_to_ptr.vmem [resolvable:$true] %s29_s19  ;;  %s20_s21 = int_to_ptr.vmem [resolvable:$true] %s19_s21 }
   0x4   :  { %s248_s24 = scalar_lea.hbm %s435_s1, 64 }
   0x5   :  { %p249_p0 = scmp.ne.s32.totalorder %s435_s1, %s248_s24  ;;  %p252_p1 = scmp.lt.u32.totalorder %s248_s24, %s435_s1 }
   0x7   :  { %p254_p2 = pnand %p252_p1, %p249_p0 }
   0x9   :  { %257 = shalt.err (!%p254_p2)
}
   0xa   :  { %s258_s29 = scalar_lea.vmem %s30_s19, 64  ;;  %p263_p4 = scmp.lt.s32.totalorder %s30_s19, %s30_s19 }
   0xb   :  { %p259_p3 = scmp.ne.s32.totalorder %s30_s19, %s258_s29  ;;  %p264_p5 = scmp.lt.s32.totalorder %s258_s29, %s258_s29 }
   0xd   :  { %p265_p6 = por %p264_p5, %p263_p4 }
   0xf   :  { %p266_p7 = pnand %p265_p6, %p259_p3 }
  0x11   :  { %269 = shalt.err (!%p266_p7)
}
  0x12   :  { %32 = dma.hbm_to_vmem [thread:$0]  %s435_s1, 64, %s30_s19, [#allocation6]  }
  0x13   :  { %s270_s9 = scalar_lea.hbm %s434_s0, 128 }
  0x14   :  { %p271_p8 = scmp.ne.s32.totalorder %s434_s0, %s270_s9  ;;  %p274_p9 = scmp.lt.u32.totalorder %s270_s9, %s434_s0 }
  0x16   :  { %p276_p10 = pnand %p274_p9, %p271_p8 }
  0x18   :  { %279 = shalt.err (!%p276_p10)
}
  0x19   :  { %s280_s14 = scalar_lea.vmem %s20_s21, 128  ;;  %p285_p12 = scmp.lt.s32.totalorder %s20_s21, %s20_s21 }
  0x1a   :  { %p281_p11 = scmp.ne.s32.totalorder %s20_s21, %s280_s14  ;;  %p286_p13 = scmp.lt.s32.totalorder %s280_s14, %s280_s14 }
  0x1c   :  { %p287_p0 = por %p286_p13, %p285_p12 }
  0x1e   :  { %p288_p1 = pnand %p287_p0, %p281_p11 }
  0x20   :  { %291 = shalt.err (!%p288_p1)
}
  0x21   :  { %22 = dma.hbm_to_vmem [thread:$0]  %s434_s0, 128, %s20_s21, [#allocation3]  }
  0x22   :  { %s344_s16 = smov [#allocation7]   ;;  %s292_s20 = scalar_lea.hbm %s437_s3, 256 }
  0x23   :  { %s40_s17 = sshll.u32 %s344_s16, 4  ;;  %p293_p2 = scmp.ne.s32.totalorder %s437_s3, %s292_s20  ;;  %s41_s17 = int_to_ptr.vmem [resolvable:$true] %s40_s17 }
  0x24   :  { %p296_p3 = scmp.lt.u32.totalorder %s292_s20, %s437_s3 }
  0x26   :  { %p298_p4 = pnand %p296_p3, %p293_p2 }
  0x28   :  { %301 = shalt.err (!%p298_p4)
}
  0x29   :  { %s302_s26 = scalar_lea.vmem %s41_s17, 256  ;;  %p307_p6 = scmp.lt.s32.totalorder %s41_s17, %s41_s17 }
  0x2a   :  { %p303_p5 = scmp.ne.s32.totalorder %s41_s17, %s302_s26  ;;  %p308_p7 = scmp.lt.s32.totalorder %s302_s26, %s302_s26 }
  0x2c   :  { %p309_p8 = por %p308_p7, %p307_p6 }
  0x2e   :  { %p310_p9 = pnand %p309_p8, %p303_p5 }
  0x30   :  { %313 = shalt.err (!%p310_p9)
}
  0x31   :  { %s345_s0 = smov 64   ;;  %s346_s21 = smov 4  }
  0x32   :  { %46 = dma.hbm_to_vmem [thread:$0]  %s437_s3, 256, %s41_s17, [#allocation6], %s345_s0, %s345_s0, %s346_s21  }
  0x33   :  { %336 = dma.done.wait [#allocation3], 128  }
  0x34   :  { %337 = vsyncadd [#allocation3], 4294967168 }
  0x35   :  { %338 = dma.done.wait [#allocation6], 320  }
  0x36   :  { %339 = vsyncadd [#allocation6], 4294966976  ;;  %v347_v0 = vmov 0.0   ;;  %vm348_vm0 = vmmov 0   ;;  %vm73_vm1 = vcmask 1043456   ;;  %v59_v2 = vld [vmem:[#allocation2] sm:$0xff] }
  0x37   :  { %220 = vmatprep.subr.bf16.mxu0 %v347_v0  ;;  %222 = vmatprep.mubr.msk.bf16.mxu0 %vm348_vm0, %v347_v0  ;;  %v61_v1 = vld [vmem:[#allocation5] sm:$0xf]  ;;  %v60_v4 = vpack.c.bf16 %v59_v2, %v59_v2  ;;  %vm69_vm2 = vcmask 64512   ;;  %v242_v5 = vld [vmem:[#allocation7] sm:$0xff]   ;;  %v243_v6 = vld [vmem:[#allocation7 + $0x8] sm:$0xff]   ;;  %vm142_vm3 = vcmask 261120  }
  0x38   :  { %226 = vmatprep.subr.bf16.mxu1 %v347_v0  ;;  %230 = vmatprep.mubr.msk.bf16.mxu1 %vm348_vm0, %v347_v0  ;;  %v75_v3 = vsel %vm73_vm1, %v61_v1, 0  ;;  %v209_v7 = vld [vmem:[%s436_s2] ss:$0 sm:$0xff]  ;;  %s349_s2 = smov [#allocation8]   ;;  %vm191_vm4 = vcmask 523264  }
  0x39   :  { %221 = vmatpush3.bf16.msra.mxu0 %v75_v3  ;;  %227 = vmatpush3.bf16.msra.mxu1 %v242_v5  ;;  %v211_v15 = vld [vmem:[%s438_s4] ss:$0 sm:$0xff]  ;;  %s199_s7 = sshll.u32 %s349_s2, 4  ;;  %s200_s7 = int_to_ptr.vmem [resolvable:$true] %s199_s7 }
  0x3a   :  { %228 = vmatprep.subr.bf16.mxu1 %v347_v0  ;;  %s314_s8 = scalar_lea.vmem %s200_s7, 128  ;;  %p319_p11 = scmp.lt.s32.totalorder %s200_s7, %s200_s7 }
  0x3b   :  { %p315_p10 = scmp.ne.s32.totalorder %s200_s7, %s314_s8  ;;  %p320_p12 = scmp.lt.s32.totalorder %s314_s8, %s314_s8 }
  0x3c   :  { %223 = vmatmul.mubr.msk.bf16.vlgmr.msra.gmra.mrb[0].mxu0 %vm69_vm2, %v60_v4 }
  0x3d   :  { %229 = vmatpush3.bf16.msra.mxu1 %v243_v6  ;;  %p321_p13 = por %p320_p12, %p319_p11 }
  0x3f   :  { %p322_p0 = pnand %p321_p13, %p315_p10 }
 0x10f   :  { %v111_v8 = vpop.f32.mrb[0].mxu0 }
 0x110   :  { %v112_v9 = vadd.f32 %v209_v7, %v111_v8  ;;  %v224_v10 = vpop.f32.mrb[1].mxu0 }
 0x111   :  { %v114_v11 = vpop.f32.mrb[2].mxu0 }
 0x112   :  { %v117_v12 = vmax.f32 %v112_v9, 0.0  ;;  %v225_v13 = vpop.f32.mrb[3].mxu0 }
 0x114   :  { %v118_v14 = vpack.c.bf16 %v117_v12, %v117_v12 }
 0x116   :  { %231 = vmatmul.mubr.msk.bf16.vlgmr.msra.gmra.mrb[0].mxu1 %vm142_vm3, %v118_v14 }
 0x1e9   :  { %v180_v16 = vpop.f32.mrb[0].mxu1 }
 0x1ea   :  { %v181_v17 = vadd.f32 %v211_v15, %v180_v16  ;;  %v232_v18 = vpop.f32.mrb[1].mxu1 }
 0x1eb   :  { %v183_v19 = vpop.f32.mrb[2].mxu1 }
 0x1ec   :  { %v186_v20 = vsub.f32 0.0, %v181_v17  ;;  %v233_v21 = vpop.f32.mrb[3].mxu1 }
 0x1ee   :  { %v187_v22 = vmul.f32 1.442695, %v186_v20 }
 0x1f0   :  { %244 = vpow2.f32 %v187_v22 }
 0x1fa   :  { %v245_v23 = vpop.eup %244 }
 0x1fb   :  { %v189_v24 = vadd.f32 1.0, %v245_v23 }
 0x1fd   :  { %246 = vrcp.f32 %v189_v24 }
 0x207   :  { %v247_v25 = vpop.eup %246 }
 0x208   :  { %192 = vst.msk [vmem:[#allocation8] sm:$0xff] %vm191_vm4, %v247_v25 }
 0x209   :  { %325 = shalt.err (!%p322_p0)
}
 0x20a   :  { %s326_s10 = scalar_lea.hbm %s439_s5, 128 }
 0x20b   :  { %p327_p1 = scmp.ne.s32.totalorder %s439_s5, %s326_s10  ;;  %p330_p2 = scmp.lt.u32.totalorder %s326_s10, %s439_s5 }
 0x20d   :  { %p332_p3 = pnand %p330_p2, %p327_p1 }
 0x20f   :  { %335 = shalt.err (!%p332_p3)
}
 0x210   :  { %202 = dma.vmem_to_hbm [thread:$0]  %s200_s7, 128, %s439_s5, [#allocation4]  }
 0x211   :  { %340 = dma.done.wait [#allocation4], 128  }
 0x212   :  { %341 = vsyncadd [#allocation4], 4294967168 }
 0x213   :  { %206 = vsyncpa [#allocation3], 1 }
 0x214   :  { %207 = vsyncpa [#allocation6], 1 }
 0x215   :  { %208 = vsyncpa [#allocation4], 1 }

</bundles_post_ra>
